<compile_context>
chip_gen: v6e
topology: v6e:2x2x1
jax: 0.10.0
libtpu: 0.0.40
codegen_flags: <defaults>
</compile_context>

<pallas_src>
import jax
import jax.numpy as jnp
from jax.experimental import pallas as pl
from jax.experimental.pallas import tpu as pltpu


def rotate_kernel(rm_ref, pos_ref, quat_ref, rootrot_ref,
                  newpos_ref, newroot_ref):
    # ---- positions: new_P[i, :, :] = sum_k R[i, k, :] * P[k, :, :] ----------
    R = rm_ref[...]                       # (3, 3, TB)
    P = pos_ref[...]                      # (3, J, TB)
    p0, p1, p2 = P[0], P[1], P[2]         # (J, TB) each, lane-dense

    rows = []
    for i in range(3):                    # unrolled: 9 vmul + 6 vadd, all VPU
        ri = R[i]                         # (3, TB)
        rows.append(ri[0:1, :] * p0 + ri[1:2, :] * p1 + ri[2:3, :] * p2)
    newpos_ref[...] = jnp.stack(rows, axis=0).astype(newpos_ref.dtype)  # one store

    # ---- root-joint quaternion: quaternion_multiply(q, r), wxyz -------------
    q = quat_ref[...]                     # (4, TB)
    r = rootrot_ref[...]                  # (4, TB)
    w1, x1, y1, z1 = q[0:1], q[1:2], q[2:3], q[3:4]
    w2, x2, y2, z2 = r[0:1], r[1:2], r[2:3], r[3:4]

    ow = w1 * w2 - x1 * x2 - y1 * y2 - z1 * z2
    ox = w1 * x2 + x1 * w2 + y1 * z2 - z1 * y2
    oy = w1 * y2 - x1 * z2 + y1 * w2 + z1 * x2
    oz = w1 * z2 + x1 * y2 - y1 * x2 + z1 * w2

    newroot_ref[...] = jnp.concatenate(
        [ow, ox, oy, oz], axis=0).astype(newroot_ref.dtype)             # one store


def _pick_batch_tile(B):
    # Lane-dense batch tile: a multiple of 128 when the batch divides cleanly
    # (keeping >= 2 grid steps so the v7x megacore can shard the parallel axis),
    # otherwise take the whole batch in one step (block == full dim is legal).
    for tb in (1024, 512, 256, 128):
        if B % tb == 0 and B >= 2 * tb:
            return tb
    return B


def rotate_forward(joint_positions, joint_rotations, rotation_matrix,
                   rotation_quat, root_idx):
    B, J, _ = joint_positions.shape
    pos_dtype = joint_positions.dtype
    rot_dtype = joint_rotations.dtype

    # quat repeat logic from the module (quats.shape[0] == 1 -> broadcast to B;
    # otherwise repeat_interleave(len(root_idx)=1) is an identity).
    quat = rotation_quat
    if quat.shape[0] == 1:
        quat = jnp.broadcast_to(quat, (B, 4))

    # Lane-dense (batch-last) layouts for the kernel.
    pos_t = jnp.transpose(joint_positions, (2, 1, 0))        # (3, J, B)
    rm_t = jnp.transpose(rotation_matrix, (1, 2, 0))         # (3, 3, B)
    quat_t = jnp.transpose(quat, (1, 0))                     # (4, B)
    root_rot = joint_rotations[:, root_idx[0], :]            # (B, 4)
    rootrot_t = jnp.transpose(root_rot, (1, 0))              # (4, B)

    TB = _pick_batch_tile(B)
    grid = (B // TB,)

    newpos_t, newroot_t = pl.pallas_call(
        rotate_kernel,
        out_shape=(
            jax.ShapeDtypeStruct((3, J, B), pos_dtype),
            jax.ShapeDtypeStruct((4, B), rot_dtype),
        ),
        grid=grid,
        in_specs=[
            pl.BlockSpec((3, 3, TB), lambda b: (0, 0, b)),   # rotation matrices
            pl.BlockSpec((3, J, TB), lambda b: (0, 0, b)),   # joint positions
            pl.BlockSpec((4, TB), lambda b: (0, b)),         # rotation quats
            pl.BlockSpec((4, TB), lambda b: (0, b)),         # root joint quats
        ],
        out_specs=(
            pl.BlockSpec((3, J, TB), lambda b: (0, 0, b)),   # new positions
            pl.BlockSpec((4, TB), lambda b: (0, b)),         # new root quats
        ),
        compiler_params=pltpu.CompilerParams(
            dimension_semantics=("parallel",)),
    )(rm_t, pos_t, quat_t, rootrot_t)

    new_positions = jnp.transpose(newpos_t, (2, 1, 0))       # (B, J, 3)
    new_root = jnp.transpose(newroot_t, (1, 0))              # (B, 4)

    # Single-row patch of the (B, J, 4) tensor done by XLA in the wrapper so
    # the kernel never round-trips the full joint_rotations just to rewrite
    # one row (perf-review item: halves the kernel's HBM traffic).
    new_rotations = joint_rotations.at[:, root_idx[0], :].set(new_root)
    return new_positions, new_rotations


def _quat_mul_ref(q, r):
    w1, x1, y1, z1 = q[..., 0], q[..., 1], q[..., 2], q[..., 3]
    w2, x2, y2, z2 = r[..., 0], r[..., 1], r[..., 2], r[..., 3]
    return jnp.stack([
        w1 * w2 - x1 * x2 - y1 * y2 - z1 * z2,
        w1 * x2 + x1 * w2 + y1 * z2 - z1 * y2,
        w1 * y2 - x1 * z2 + y1 * w2 + z1 * x2,
        w1 * z2 + x1 * y2 - y1 * x2 + z1 * w2,
    ], axis=-1)


if __name__ == "__main__":
    B, J = 2, 8
    key = jax.random.PRNGKey(0)
    k1, k2, k3 = jax.random.split(key, 3)

    # Deterministic rotations around the z axis (matrix + matching quaternion),
    # standing in for Rotate.generate_random_rotations output.
    theta = jax.random.uniform(k1, (B,), minval=0.0, maxval=2.0 * jnp.pi)
    c, s = jnp.cos(theta), jnp.sin(theta)
    z = jnp.zeros_like(c)
    o = jnp.ones_like(c)
    rotation_matrix = jnp.stack([
        jnp.stack([c, -s, z], axis=-1),
        jnp.stack([s, c, z], axis=-1),
        jnp.stack([z, z, o], axis=-1),
    ], axis=1).astype(jnp.float32)                                  # (B, 3, 3)
    rotation_quat = jnp.stack(
        [jnp.cos(theta / 2), z, z, jnp.sin(theta / 2)], axis=-1
    ).astype(jnp.float32)                                           # (B, 4) wxyz

    joint_positions = jax.random.normal(k2, (B, J, 3), jnp.float32)
    joint_rotations = jax.random.normal(k3, (B, J, 4), jnp.float32)
    joint_rotations = joint_rotations / jnp.linalg.norm(
        joint_rotations, axis=-1, keepdims=True)

    root_idx = jnp.array([0], dtype=jnp.int32)                      # module buffer

    new_pos, new_rot = rotate_forward(
        joint_positions, joint_rotations, rotation_matrix, rotation_quat,
        root_idx)
    jax.block_until_ready((new_pos, new_rot))

    # Pure-JAX reference of the PyTorch forward.
    ref_pos = jnp.einsum("bij,bnj->bni", rotation_matrix, joint_positions)
    ref_rot = joint_rotations.at[:, 0, :].set(
        _quat_mul_ref(rotation_quat, joint_rotations[:, 0, :]))

    assert jnp.allclose(new_pos, ref_pos, rtol=1e-5, atol=1e-5)
    assert jnp.allclose(new_rot, ref_rot, rtol=1e-5, atol=1e-5)
    print("KERNEL_OK")
</pallas_src>

<mosaic_0001>
module attributes {stable_mosaic.version = 11 : i64} {
  func.func @rotate_kernel(%arg0: i32, %arg1: memref<3x3x2xf32, #tpu.memory_space<vmem>>, %arg2: memref<3x8x2xf32, #tpu.memory_space<vmem>>, %arg3: memref<4x2xf32, #tpu.memory_space<vmem>>, %arg4: memref<4x2xf32, #tpu.memory_space<vmem>>, %arg5: memref<3x8x2xf32, #tpu.memory_space<vmem>>, %arg6: memref<4x2xf32, #tpu.memory_space<vmem>>) attributes {dimension_semantics = [#tpu.dimension_semantics<parallel>], iteration_bounds = array<i64: 1>, scalar_prefetch = 0 : i64, scratch_operands = 0 : i64, tpu.core_type = #tpu.core_type<tc>, window_params = [{transform_indices = @transform_0, window_bounds = array<i64: 3, 3, 2>}, {transform_indices = @transform_1, window_bounds = array<i64: 3, 8, 2>}, {transform_indices = @transform_2, window_bounds = array<i64: 4, 2>}, {transform_indices = @transform_3, window_bounds = array<i64: 4, 2>}, {transform_indices = @transform_4, window_bounds = array<i64: 3, 8, 2>}, {transform_indices = @transform_5, window_bounds = array<i64: 4, 2>}]} {
    %c0 = arith.constant 0 : index
    %c0_0 = arith.constant 0 : index
    %c0_1 = arith.constant 0 : index
    %0 = vector.load %arg1[%c0, %c0_0, %c0_1] : memref<3x3x2xf32, #tpu.memory_space<vmem>>, vector<3x3x2xf32>
    %c0_2 = arith.constant 0 : index
    %c0_3 = arith.constant 0 : index
    %c0_4 = arith.constant 0 : index
    %1 = vector.load %arg2[%c0_2, %c0_3, %c0_4] : memref<3x8x2xf32, #tpu.memory_space<vmem>>, vector<3x8x2xf32>
    %2 = vector.extract_strided_slice %1 {offsets = [0, 0, 0], sizes = [1, 8, 2], strides = [1, 1, 1]} : vector<3x8x2xf32> to vector<1x8x2xf32>
    %3 = vector.shape_cast %2 : vector<1x8x2xf32> to vector<8x2xf32>
    %4 = vector.extract_strided_slice %1 {offsets = [1, 0, 0], sizes = [1, 8, 2], strides = [1, 1, 1]} : vector<3x8x2xf32> to vector<1x8x2xf32>
    %5 = vector.shape_cast %4 : vector<1x8x2xf32> to vector<8x2xf32>
    %6 = vector.extract_strided_slice %1 {offsets = [2, 0, 0], sizes = [1, 8, 2], strides = [1, 1, 1]} : vector<3x8x2xf32> to vector<1x8x2xf32>
    %7 = vector.shape_cast %6 : vector<1x8x2xf32> to vector<8x2xf32>
    %8 = vector.extract_strided_slice %0 {offsets = [0, 0, 0], sizes = [1, 3, 2], strides = [1, 1, 1]} : vector<3x3x2xf32> to vector<1x3x2xf32>
    %9 = vector.shape_cast %8 : vector<1x3x2xf32> to vector<3x2xf32>
    %10 = vector.extract_strided_slice %9 {offsets = [0, 0], sizes = [1, 2], strides = [1, 1]} : vector<3x2xf32> to vector<1x2xf32>
    %11 = vector.broadcast %10 : vector<1x2xf32> to vector<8x2xf32>
    %12 = arith.mulf %11, %3 : vector<8x2xf32>
    %13 = vector.extract_strided_slice %9 {offsets = [1, 0], sizes = [1, 2], strides = [1, 1]} : vector<3x2xf32> to vector<1x2xf32>
    %14 = vector.broadcast %13 : vector<1x2xf32> to vector<8x2xf32>
    %15 = arith.mulf %14, %5 : vector<8x2xf32>
    %16 = arith.addf %12, %15 : vector<8x2xf32>
    %17 = vector.extract_strided_slice %9 {offsets = [2, 0], sizes = [1, 2], strides = [1, 1]} : vector<3x2xf32> to vector<1x2xf32>
    %18 = vector.broadcast %17 : vector<1x2xf32> to vector<8x2xf32>
    %19 = arith.mulf %18, %7 : vector<8x2xf32>
    %20 = arith.addf %16, %19 : vector<8x2xf32>
    %21 = vector.extract_strided_slice %0 {offsets = [1, 0, 0], sizes = [1, 3, 2], strides = [1, 1, 1]} : vector<3x3x2xf32> to vector<1x3x2xf32>
    %22 = vector.shape_cast %21 : vector<1x3x2xf32> to vector<3x2xf32>
    %23 = vector.extract_strided_slice %22 {offsets = [0, 0], sizes = [1, 2], strides = [1, 1]} : vector<3x2xf32> to vector<1x2xf32>
    %24 = vector.broadcast %23 : vector<1x2xf32> to vector<8x2xf32>
    %25 = arith.mulf %24, %3 : vector<8x2xf32>
    %26 = vector.extract_strided_slice %22 {offsets = [1, 0], sizes = [1, 2], strides = [1, 1]} : vector<3x2xf32> to vector<1x2xf32>
    %27 = vector.broadcast %26 : vector<1x2xf32> to vector<8x2xf32>
    %28 = arith.mulf %27, %5 : vector<8x2xf32>
    %29 = arith.addf %25, %28 : vector<8x2xf32>
    %30 = vector.extract_strided_slice %22 {offsets = [2, 0], sizes = [1, 2], strides = [1, 1]} : vector<3x2xf32> to vector<1x2xf32>
    %31 = vector.broadcast %30 : vector<1x2xf32> to vector<8x2xf32>
    %32 = arith.mulf %31, %7 : vector<8x2xf32>
    %33 = arith.addf %29, %32 : vector<8x2xf32>
    %34 = vector.extract_strided_slice %0 {offsets = [2, 0, 0], sizes = [1, 3, 2], strides = [1, 1, 1]} : vector<3x3x2xf32> to vector<1x3x2xf32>
    %35 = vector.shape_cast %34 : vector<1x3x2xf32> to vector<3x2xf32>
    %36 = vector.extract_strided_slice %35 {offsets = [0, 0], sizes = [1, 2], strides = [1, 1]} : vector<3x2xf32> to vector<1x2xf32>
    %37 = vector.broadcast %36 : vector<1x2xf32> to vector<8x2xf32>
    %38 = arith.mulf %37, %3 : vector<8x2xf32>
    %39 = vector.extract_strided_slice %35 {offsets = [1, 0], sizes = [1, 2], strides = [1, 1]} : vector<3x2xf32> to vector<1x2xf32>
    %40 = vector.broadcast %39 : vector<1x2xf32> to vector<8x2xf32>
    %41 = arith.mulf %40, %5 : vector<8x2xf32>
    %42 = arith.addf %38, %41 : vector<8x2xf32>
    %43 = vector.extract_strided_slice %35 {offsets = [2, 0], sizes = [1, 2], strides = [1, 1]} : vector<3x2xf32> to vector<1x2xf32>
    %44 = vector.broadcast %43 : vector<1x2xf32> to vector<8x2xf32>
    %45 = arith.mulf %44, %7 : vector<8x2xf32>
    %46 = arith.addf %42, %45 : vector<8x2xf32>
    %47 = vector.shape_cast %20 : vector<8x2xf32> to vector<1x8x2xf32>
    %48 = vector.shape_cast %33 : vector<8x2xf32> to vector<1x8x2xf32>
    %49 = vector.shape_cast %46 : vector<8x2xf32> to vector<1x8x2xf32>
    %50 = tpu.concatenate %47, %48, %49 in 0 : vector<1x8x2xf32>, vector<1x8x2xf32>, vector<1x8x2xf32> -> vector<3x8x2xf32>
    %c0_5 = arith.constant 0 : index
    %c0_6 = arith.constant 0 : index
    %c0_7 = arith.constant 0 : index
    %51 = vector.load %arg5[%c0_5, %c0_6, %c0_7] : memref<3x8x2xf32, #tpu.memory_space<vmem>>, vector<3x8x2xf32>
    tpu.vector_store %arg5[%c0_5, %c0_6, %c0_7], %50 {strides = array<i32>} : memref<3x8x2xf32, #tpu.memory_space<vmem>>, vector<3x8x2xf32>,
    %c0_8 = arith.constant 0 : index
    %c0_9 = arith.constant 0 : index
    %52 = vector.load %arg3[%c0_8, %c0_9] : memref<4x2xf32, #tpu.memory_space<vmem>>, vector<4x2xf32>
    %c0_10 = arith.constant 0 : index
    %c0_11 = arith.constant 0 : index
    %53 = vector.load %arg4[%c0_10, %c0_11] : memref<4x2xf32, #tpu.memory_space<vmem>>, vector<4x2xf32>
    %54 = vector.extract_strided_slice %52 {offsets = [0, 0], sizes = [1, 2], strides = [1, 1]} : vector<4x2xf32> to vector<1x2xf32>
    %55 = vector.extract_strided_slice %52 {offsets = [1, 0], sizes = [1, 2], strides = [1, 1]} : vector<4x2xf32> to vector<1x2xf32>
    %56 = vector.extract_strided_slice %52 {offsets = [2, 0], sizes = [1, 2], strides = [1, 1]} : vector<4x2xf32> to vector<1x2xf32>
    %57 = vector.extract_strided_slice %52 {offsets = [3, 0], sizes = [1, 2], strides = [1, 1]} : vector<4x2xf32> to vector<1x2xf32>
    %58 = vector.extract_strided_slice %53 {offsets = [0, 0], sizes = [1, 2], strides = [1, 1]} : vector<4x2xf32> to vector<1x2xf32>
    %59 = vector.extract_strided_slice %53 {offsets = [1, 0], sizes = [1, 2], strides = [1, 1]} : vector<4x2xf32> to vector<1x2xf32>
    %60 = vector.extract_strided_slice %53 {offsets = [2, 0], sizes = [1, 2], strides = [1, 1]} : vector<4x2xf32> to vector<1x2xf32>
    %61 = vector.extract_strided_slice %53 {offsets = [3, 0], sizes = [1, 2], strides = [1, 1]} : vector<4x2xf32> to vector<1x2xf32>
    %62 = arith.mulf %54, %58 : vector<1x2xf32>
    %63 = arith.mulf %55, %59 : vector<1x2xf32>
    %64 = arith.subf %62, %63 : vector<1x2xf32>
    %65 = arith.mulf %56, %60 : vector<1x2xf32>
    %66 = arith.subf %64, %65 : vector<1x2xf32>
    %67 = arith.mulf %57, %61 : vector<1x2xf32>
    %68 = arith.subf %66, %67 : vector<1x2xf32>
    %69 = arith.mulf %54, %59 : vector<1x2xf32>
    %70 = arith.mulf %55, %58 : vector<1x2xf32>
    %71 = arith.addf %69, %70 : vector<1x2xf32>
    %72 = arith.mulf %56, %61 : vector<1x2xf32>
    %73 = arith.addf %71, %72 : vector<1x2xf32>
    %74 = arith.mulf %57, %60 : vector<1x2xf32>
    %75 = arith.subf %73, %74 : vector<1x2xf32>
    %76 = arith.mulf %54, %60 : vector<1x2xf32>
    %77 = arith.mulf %55, %61 : vector<1x2xf32>
    %78 = arith.subf %76, %77 : vector<1x2xf32>
    %79 = arith.mulf %56, %58 : vector<1x2xf32>
    %80 = arith.addf %78, %79 : vector<1x2xf32>
    %81 = arith.mulf %57, %59 : vector<1x2xf32>
    %82 = arith.addf %80, %81 : vector<1x2xf32>
    %83 = arith.mulf %54, %61 : vector<1x2xf32>
    %84 = arith.mulf %55, %60 : vector<1x2xf32>
    %85 = arith.addf %83, %84 : vector<1x2xf32>
    %86 = arith.mulf %56, %59 : vector<1x2xf32>
    %87 = arith.subf %85, %86 : vector<1x2xf32>
    %88 = arith.mulf %57, %58 : vector<1x2xf32>
    %89 = arith.addf %87, %88 : vector<1x2xf32>
    %90 = tpu.concatenate %68, %75, %82, %89 in 0 : vector<1x2xf32>, vector<1x2xf32>, vector<1x2xf32>, vector<1x2xf32> -> vector<4x2xf32>
    %c0_12 = arith.constant 0 : index
    %c0_13 = arith.constant 0 : index
    %91 = vector.load %arg6[%c0_12, %c0_13] : memref<4x2xf32, #tpu.memory_space<vmem>>, vector<4x2xf32>
    tpu.vector_store %arg6[%c0_12, %c0_13], %90 {strides = array<i32>} : memref<4x2xf32, #tpu.memory_space<vmem>>, vector<4x2xf32>,
    return
  }
  func.func @transform_0(%arg0: i32) -> (i32, i32, i32) {
    %c0_i32 = arith.constant 0 : i32
    %c0_i32_0 = arith.constant 0 : i32
    %c0_i32_1 = arith.constant 0 : i32
    return %c0_i32, %c0_i32_0, %arg0 : i32, i32, i32
  }
  func.func @transform_1(%arg0: i32) -> (i32, i32, i32) {
    %c0_i32 = arith.constant 0 : i32
    %c0_i32_0 = arith.constant 0 : i32
    %c0_i32_1 = arith.constant 0 : i32
    return %c0_i32, %c0_i32_0, %arg0 : i32, i32, i32
  }
  func.func @transform_2(%arg0: i32) -> (i32, i32) {
    %c0_i32 = arith.constant 0 : i32
    %c0_i32_0 = arith.constant 0 : i32
    return %c0_i32, %arg0 : i32, i32
  }
  func.func @transform_3(%arg0: i32) -> (i32, i32) {
    %c0_i32 = arith.constant 0 : i32
    %c0_i32_0 = arith.constant 0 : i32
    return %c0_i32, %arg0 : i32, i32
  }
  func.func @transform_4(%arg0: i32) -> (i32, i32, i32) {
    %c0_i32 = arith.constant 0 : i32
    %c0_i32_0 = arith.constant 0 : i32
    %c0_i32_1 = arith.constant 0 : i32
    return %c0_i32, %c0_i32_0, %arg0 : i32, i32, i32
  }
  func.func @transform_5(%arg0: i32) -> (i32, i32) {
    %c0_i32 = arith.constant 0 : i32
    %c0_i32_0 = arith.constant 0 : i32
    return %c0_i32, %arg0 : i32, i32
  }
}

</mosaic_0001>

<bundles_post_ra>
// kernel: tpu_custom_call.1
= control target key start
LH: loop header
LB: loop body
LE: loop exit
PB: predicated region body
PF: predicated region fallthrough
CT: control target
= control target key end

     0   :  { %v25_v0 = vlaneseq  ;;  %vm76_vm0 = vcmask 15360   ;;  %vm153_vm1 = vcmask 1040384   ;;  %vm155_vm2 = vcmask 1041408   ;;  %s262_s0 = inlined_call_operand.vmem [shape: f32[3,3,2], index: 0, kind: input, shape index: {}]   ;;  %s263_s2 = inlined_call_operand.vmem [shape: f32[4,2], index: 2, kind: input, shape index: {}]   ;;  %s264_s3 = inlined_call_operand.vmem [shape: f32[4,2], index: 3, kind: input, shape index: {}]   ;;  %s265_s1 = inlined_call_operand.vmem [shape: f32[3,8,2], index: 1, kind: input, shape index: {}]   ;;  %s266_s4 = inlined_call_operand.vmem [shape: f32[3,8,2], index: 4, kind: output, shape index: {0}]   ;;  %s267_s5 = inlined_call_operand.vmem [shape: f32[4,2], index: 5, kind: output, shape index: {1}]  }
   0x1   :  { %v19_v1 = vld [vmem:[%s262_s0] sm:$0x7]  ;;  %v20_v3 = vld [vmem:[%s262_s0 + $0x4] sm:$0x7]  ;;  %v21_v10 = vld [vmem:[%s262_s0 + $0x8] sm:$0x7] }
   0x2   :  { %v26_v2 = vshrl.u32 %v25_v0, 7  ;;  %v208_v4 = vld [vmem:[%s263_s2] sm:$0xf]  ;;  %v23_v12 = vld [vmem:[%s265_s1 + $0x8] sm:$0xff]  ;;  %v24_v13 = vld [vmem:[%s265_s1 + $0x10] sm:$0xff]  ;;  %vm157_vm3 = vcmask 1042432  }
   0x3   :  { %v213_v5 = vld [vmem:[%s264_s3] sm:$0xf]  ;;  %vm159_vm4 = vcmask 11264  }
   0x4   :  { %v22_v6 = vld [vmem:[%s265_s1] sm:$0xff]  ;;  %v27_v7 = vsub.s32 0, %v26_v2  ;;  %v32_v8 = vsub.s32 1, %v26_v2  ;;  %v38_v9 = vsub.s32 2, %v26_v2  ;;  %v223_v11 = vmul.f32 %v213_v5, %v208_v4 }
   0x5   :  { %v94_v14 = vrot.slane %v213_v5, 1  ;;  %v97_v15 = vrot.slane %v213_v5, 7  ;;  %v111_v16 = vrot.slane %v213_v5, 2  ;;  %v118_v17 = vrot.slane %v213_v5, 6 }
   0x6   :  { %v28_v18 = vrot.slane %v19_v1, %v27_v7  ;;  %v33_v19 = vrot.slane %v19_v1, %v32_v8  ;;  %v39_v20 = vrot.slane %v19_v1, %v38_v9  ;;  %v45_v21 = vrot.slane %v20_v3, %v27_v7 }
   0x7   :  { %v50_v22 = vrot.slane %v20_v3, %v32_v8  ;;  %v56_v23 = vrot.slane %v20_v3, %v38_v9  ;;  %v62_v24 = vrot.slane %v21_v10, %v27_v7  ;;  %v67_v25 = vrot.slane %v21_v10, %v32_v8 }
   0x8   :  { %v29_v26 = vmul.f32 %v28_v18, %v22_v6  ;;  %v34_v27 = vmul.f32 %v33_v19, %v23_v12  ;;  %v40_v28 = vmul.f32 %v39_v20, %v24_v13  ;;  %v46_v29 = vmul.f32 %v45_v21, %v22_v6 }
   0x9   :  { %v51_v30 = vmul.f32 %v50_v22, %v23_v12  ;;  %v57_v31 = vmul.f32 %v56_v23, %v24_v13  ;;  %v63_v32 = vmul.f32 %v62_v24, %v22_v6  ;;  %v68_v33 = vmul.f32 %v67_v25, %v23_v12 }
   0xa   :  { %v35_v34 = vadd.f32 %v34_v27, %v29_v26  ;;  %v73_v35 = vrot.slane %v21_v10, %v38_v9  ;;  %v84_v36 = vrot.slane %v223_v11, 1  ;;  %v87_v39 = vrot.slane %v223_v11, 2 }
   0xb   :  { %v52_v37 = vadd.f32 %v51_v30, %v46_v29  ;;  %v69_v38 = vadd.f32 %v68_v33, %v63_v32  ;;  %v96_v40 = vmul.f32 %v94_v14, %v208_v4  ;;  %v99_v44 = vmul.f32 %v97_v15, %v208_v4 }
   0xc   :  { %v41_v41 = vadd.f32 %v40_v28, %v35_v34  ;;  %v74_v42 = vmul.f32 %v73_v35, %v24_v13  ;;  %v86_v43 = vsub.f32 %v223_v11, %v84_v36  ;;  %v113_v46 = vmul.f32 %v111_v16, %v208_v4 }
   0xd   :  { %v58_v45 = vadd.f32 %v57_v31, %v52_v37  ;;  %v120_v47 = vmul.f32 %v118_v17, %v208_v4  ;;  %v90_v49 = vrot.slane %v223_v11, 3  ;;  %v101_v50 = vrot.slane %v99_v44, 1 }
   0xe   :  { %77 = vst.msk [vmem:[%s266_s4] sm:$0xff] %vm76_vm0, %v41_v41  ;;  %v75_v48 = vadd.f32 %v74_v42, %v69_v38  ;;  %v105_v51 = vrot.slane %v96_v40, 2  ;;  %v89_v52 = vsub.f32 %v86_v43, %v87_v39  ;;  %v115_v53 = vrot.slane %v113_v46, 1 }
   0xf   :  { %78 = vst.msk [vmem:[%s266_s4 + $0x8] sm:$0xff] %vm76_vm0, %v58_v45  ;;  %v122_v54 = vrot.slane %v120_v47, 2  ;;  %v128_v55 = vrot.slane %v213_v5, 3  ;;  %v103_v56 = vadd.f32 %v101_v50, %v96_v40  ;;  %v108_v57 = vrot.slane %v99_v44, 3 }
  0x10   :  { %79 = vst.msk [vmem:[%s266_s4 + $0x10] sm:$0xff] %vm76_vm0, %v75_v48  ;;  %v125_v58 = vrot.slane %v120_v47, 3  ;;  %v131_v59 = vrot.slane %v96_v40, 1  ;;  %v117_v60 = vsub.f32 %v113_v46, %v115_v53  ;;  %v134_v62 = vrot.slane %v99_v44, 2 }
  0x11   :  { %v130_v61 = vmul.f32 %v128_v55, %v208_v4  ;;  %v137_v63 = vrot.slane %v213_v5, 5  ;;  %v107_v0 = vadd.f32 %v105_v51, %v103_v56  ;;  %v92_v6 = vsub.f32 %v89_v52, %v90_v49 }
  0x12   :  { %v124_v1 = vadd.f32 %v122_v54, %v117_v60 }
  0x13   :  { %v133_v2 = vadd.f32 %v131_v59, %v130_v61  ;;  %v139_v3 = vmul.f32 %v137_v63, %v208_v4  ;;  %v110_v7 = vsub.f32 %v107_v0, %v108_v57 }
  0x14   :  { %v127_v8 = vadd.f32 %v125_v58, %v124_v1 }
  0x15   :  { %v136_v9 = vsub.f32 %v133_v2, %v134_v62  ;;  %v141_v10 = vrot.slane %v139_v3, 3  ;;  %v145_v11 = vrot.slane %v110_v7, 7 }
  0x16   :  { %v148_v13 = vrot.slane %v127_v8, 6 }
  0x17   :  { %v143_v12 = vadd.f32 %v141_v10, %v136_v9  ;;  %v154_v14 = vsel %vm153_vm1, %v92_v6, %v145_v11 }
  0x18   :  { %v156_v16 = vsel %vm155_vm2, %v154_v14, %v148_v13 }
  0x19   :  { %v151_v15 = vrot.slane %v143_v12, 5 }
  0x1b   :  { %v158_v5 = vsel %vm157_vm3, %v156_v16, %v151_v15 }
  0x1c   :  { %160 = vst.msk [vmem:[%s267_s5] sm:$0xf] %vm159_vm4, %v158_v5 }

</bundles_post_ra>
